<compile_context>
chip_gen: v6e
topology: v6e:2x2x1
jax: 0.10.0
libtpu: 0.0.40
codegen_flags: <defaults>
</compile_context>

<pallas_src>
import functools
import math

import jax
import jax.numpy as jnp
from jax.experimental import pallas as pl
from jax.experimental.pallas import tpu as pltpu


def _round_up(n, m):
    return ((n + m - 1) // m) * m


def _vmem_budget_bytes():
    """Generation-aware scoped-VMEM budget (v5e/v6e: 128 MiB phys, v7x: 64 MiB)."""
    try:
        cap = int(pltpu.get_tpu_info().vmem_capacity_bytes)
    except Exception:
        cap = 128 * 1024 * 1024
    # Leave headroom for compiler scratch; never ask for more than ~96 MiB.
    return min(int(cap * 0.6), 96 * 1024 * 1024)


def _pick_tile_rows(n_rows, width, itemsize, n_streams, budget_bytes,
                    *, temp_f32_arrays=3, max_rows=2048):
    """Largest row tile whose double-buffered streams + f32 temporaries fit the budget."""
    per_row = n_streams * 2 * width * itemsize + temp_f32_arrays * width * 4
    tr = max(8, budget_bytes // max(per_row, 1))
    tr = min(tr, max_rows, _round_up(n_rows, 8))
    tr = max(8, (tr // 8) * 8)
    # Prefer >= 2 grid steps when there are enough rows so both v7x TensorCores
    # (megacore) get balanced work on this memory-bound kernel.
    if n_rows > 8 and tr >= n_rows:
        tr = max(8, _round_up((n_rows + 1) // 2, 8))
    return int(tr)


# --------------------------------------------------------------------------- #
# Kernel 1: LayerNorm (PyTorch-style: unbiased std, divide by (std + eps))
# --------------------------------------------------------------------------- #
def _layernorm_kernel(x_ref, a_ref, b_ref, o_ref, *, eps, d):
    # x_ref: (tm, D), a_ref/b_ref: (1, D), o_ref: (tm, D)
    x = x_ref[...].astype(jnp.float32)
    mean = jnp.mean(x, axis=-1, keepdims=True)
    xc = x - mean
    # torch.Tensor.std(-1) defaults to unbiased (ddof = 1).
    var = jnp.sum(xc * xc, axis=-1, keepdims=True) * (1.0 / float(d - 1))
    # Per-row reciprocal: one (tm, 1) divide + a (tm, D) multiply instead of a
    # (tm, D) divide — less VALU pressure, still exact (matches torch semantics).
    inv = 1.0 / (jnp.sqrt(var) + eps)
    a = a_ref[...].astype(jnp.float32)
    b = b_ref[...].astype(jnp.float32)
    o_ref[...] = (a * (xc * inv) + b).astype(o_ref.dtype)


def _layer_norm_pallas(x2, a_2, b_2, *, eps):
    M, D = x2.shape
    budget = _vmem_budget_bytes()
    # Streams: x in + out (double buffered); ~3 f32 (tm, D) temporaries in-kernel.
    tm = _pick_tile_rows(M, D, x2.dtype.itemsize, n_streams=2,
                         budget_bytes=budget, temp_f32_arrays=3)
    kernel = functools.partial(_layernorm_kernel, eps=float(eps), d=D)
    return pl.pallas_call(
        kernel,
        out_shape=jax.ShapeDtypeStruct((M, D), x2.dtype),
        grid_spec=pltpu.PrefetchScalarGridSpec(
            num_scalar_prefetch=0,
            grid=(pl.cdiv(M, tm),),              # ragged M: masked boundary tile
            in_specs=[
                pl.BlockSpec((tm, D), lambda i: (i, 0)),   # row tile of x
                pl.BlockSpec((1, D), lambda i: (0, 0)),    # gain (resident)
                pl.BlockSpec((1, D), lambda i: (0, 0)),    # bias (resident)
            ],
            out_specs=pl.BlockSpec((tm, D), lambda i: (i, 0)),
        ),
        compiler_params=pltpu.CompilerParams(
            dimension_semantics=("parallel",),
            vmem_limit_bytes=budget,
        ),
    )(x2, a_2.reshape(1, D), b_2.reshape(1, D))


# --------------------------------------------------------------------------- #
# Kernel 2: residual + dropout  (out = x + dropout_p(sublayer_out))
# --------------------------------------------------------------------------- #
def _residual_dropout_kernel(seed_ref, x_ref, s_ref, o_ref, *, p, lane_width):
    x = x_ref[...].astype(jnp.float32)
    s = s_ref[...].astype(jnp.float32)
    if p >= 1.0:
        out = x
    elif p <= 0.0:
        out = x + s
    else:
        # Counter-based PRNG: SplitMix/Wang-style integer hash of the global flat
        # element index mixed with the seed.  Pure jnp ops (VPU only), so it
        # lowers on TPU *and* in interpret mode, with no HBM mask traffic.
        tile_rows = s_ref.shape[0]
        row0 = pl.program_id(0) * tile_rows
        rows = jax.lax.broadcasted_iota(jnp.int32, s.shape, 0) + row0
        cols = jax.lax.broadcasted_iota(jnp.int32, s.shape, 1)
        idx = (rows * lane_width + cols).astype(jnp.uint32)
        seed = seed_ref[0].astype(jnp.uint32)
        h = idx ^ (seed * jnp.uint32(0x9E3779B9))     # golden-ratio seed mixing
        h = (h ^ (h >> 16)) * jnp.uint32(0x7FEB352D)
        h = (h ^ (h >> 15)) * jnp.uint32(0x846CA68B)
        h = h ^ (h >> 16)
        # Full 32-bit threshold compare: P(keep) = 1 - p with 2^-32 resolution.
        thresh = jnp.uint32(min(int(round(p * (2.0 ** 32))), 2 ** 32 - 1))
        keep = h >= thresh
        scale = jnp.float32(1.0 / (1.0 - p))
        out = x + jnp.where(keep, s * scale, jnp.float32(0.0))
    o_ref[...] = out.astype(o_ref.dtype)


def _residual_dropout_pallas(x2, s2, *, dropout_p, seed):
    R, L = x2.shape
    budget = _vmem_budget_bytes()
    # Streams: x, s in + out (double buffered); ~4 f32/u32 (tr, L) temporaries.
    tr = _pick_tile_rows(R, L, x2.dtype.itemsize, n_streams=3,
                         budget_bytes=budget, temp_f32_arrays=4)
    kernel = functools.partial(_residual_dropout_kernel,
                               p=float(dropout_p), lane_width=L)
    seed_arr = jnp.asarray([seed], dtype=jnp.int32)
    return pl.pallas_call(
        kernel,
        out_shape=jax.ShapeDtypeStruct((R, L), x2.dtype),
        grid_spec=pltpu.PrefetchScalarGridSpec(
            num_scalar_prefetch=1,               # seed lands in SMEM
            grid=(pl.cdiv(R, tr),),              # ragged R: masked boundary tile
            in_specs=[
                pl.BlockSpec((tr, L), lambda i, seed_ref: (i, 0)),  # residual x
                pl.BlockSpec((tr, L), lambda i, seed_ref: (i, 0)),  # sublayer out
            ],
            out_specs=pl.BlockSpec((tr, L), lambda i, seed_ref: (i, 0)),
        ),
        compiler_params=pltpu.CompilerParams(
            dimension_semantics=("parallel",),
            vmem_limit_bytes=budget,
        ),
    )(seed_arr, x2, s2)


def _lane_dense_view_shape(M, D):
    """Lane-dense 2-D view (rows, lanes) of the flat data for the purely
    elementwise dropout+residual kernel (avoids masked vst stores when D < 128)."""
    N = M * D
    if D % 128 == 0:
        return M, D
    if N % 128 == 0:
        L = 128
        while L < 512 and N % (2 * L) == 0:
            L *= 2
        return N // L, L
    return M, D   # fallback: masked boundary stores


# --------------------------------------------------------------------------- #
# SublayerConnection forward
# --------------------------------------------------------------------------- #
def sublayer_connection_forward(x, a_2, b_2, sublayer, *,
                                dropout_p=0.0, eps=1e-6, seed=0):
    """x: (..., D); a_2, b_2: (D,); sublayer: JAX callable mapping (..., D)->(..., D)."""
    orig_shape = x.shape
    D = orig_shape[-1]
    if D < 2:
        raise ValueError("Unbiased (ddof=1) std requires features >= 2.")
    M = math.prod(orig_shape[:-1])
    x2 = x.reshape(M, D)

    # 1) Fused LayerNorm kernel. Tile size is derived from the per-generation VMEM
    #    budget; ragged M uses masked boundary tiles (no pad / slice HBM copies).
    normed = _layer_norm_pallas(x2, a_2, b_2, eps=eps).reshape(orig_shape)

    # 2) Arbitrary sublayer runs as plain JAX between the two kernels.
    # TODO(synk): a generic user-supplied `sublayer` cannot be fused into the Pallas
    # kernels; when it is a known matmul (FFN / out-proj), fuse the LayerNorm as its
    # prologue and dropout+residual as its epilogue to avoid the HBM round-trips of
    # `normed` and `s`.
    s = sublayer(normed)

    # 3) Fused dropout + residual add on a lane-dense flat view (reshape is free
    #    for contiguous data).
    R, L = _lane_dense_view_shape(M, D)
    out2 = _residual_dropout_pallas(x2.reshape(R, L), s.reshape(R, L),
                                    dropout_p=dropout_p, seed=seed)
    return out2.reshape(orig_shape)


# --------------------------------------------------------------------------- #
# Demo / correctness check
# --------------------------------------------------------------------------- #
if __name__ == "__main__":
    B, S, D = 2, 8, 32

    key = jax.random.PRNGKey(0)
    k_x, k_a, k_b, k_w = jax.random.split(key, 4)

    x = jax.random.normal(k_x, (B, S, D), dtype=jnp.float32)
    a_2 = 1.0 + 0.1 * jax.random.normal(k_a, (D,), dtype=jnp.float32)
    b_2 = 0.1 * jax.random.normal(k_b, (D,), dtype=jnp.float32)
    eps = 1e-6

    # A simple deterministic sublayer (linear) for the demo.
    w_sub = jax.random.normal(k_w, (D, D), dtype=jnp.float32) / (D ** 0.5)
    sublayer = lambda y: y @ w_sub

    def layernorm_ref(xx):
        mean = xx.mean(-1, keepdims=True)
        std = jnp.std(xx, axis=-1, ddof=1, keepdims=True)  # PyTorch unbiased std
        return a_2 * (xx - mean) / (std + eps) + b_2

    # ---- Path 1: eval-style (dropout_p = 0) — exact reference check ----
    out = jax.block_until_ready(
        sublayer_connection_forward(x, a_2, b_2, sublayer, dropout_p=0.0, eps=eps, seed=0))
    s_ref = sublayer(layernorm_ref(x))
    ref = x + s_ref
    assert out.shape == (B, S, D)
    assert jnp.allclose(out, ref, atol=1e-5, rtol=1e-5)

    # ---- Path 2: ragged row count (M % 8 != 0) — exercises masked boundary tiles ----
    xr = jax.random.normal(k_x, (3, 5, D), dtype=jnp.float32)
    out_r = jax.block_until_ready(
        sublayer_connection_forward(xr, a_2, b_2, sublayer, dropout_p=0.0, eps=eps, seed=0))
    ref_r = xr + sublayer(layernorm_ref(xr))
    assert jnp.allclose(out_r, ref_r, atol=1e-5, rtol=1e-5)

    # ---- Path 3: training-style (dropout_p = 0.5) — structural check ----
    p = 0.5
    out_p = jax.block_until_ready(
        sublayer_connection_forward(x, a_2, b_2, sublayer, dropout_p=p, eps=eps, seed=1234))
    assert out_p.shape == (B, S, D)
    assert bool(jnp.all(jnp.isfinite(out_p)))
    # Every element must be either the pure residual (dropped) or x + s/(1-p) (kept).
    diff = out_p - x
    ok = jnp.isclose(diff, 0.0, atol=1e-4) | jnp.isclose(diff, s_ref / (1.0 - p), atol=1e-4)
    assert bool(jnp.all(ok))

    print("KERNEL_OK")
</pallas_src>

<mosaic_0001>
module attributes {stable_mosaic.version = 11 : i64} {
  func.func @_layernorm_kernel(%arg0: i32, %arg1: memref<8x32xf32, #tpu.memory_space<vmem>>, %arg2: memref<1x32xf32, #tpu.memory_space<vmem>>, %arg3: memref<1x32xf32, #tpu.memory_space<vmem>>, %arg4: memref<8x32xf32, #tpu.memory_space<vmem>>) attributes {dimension_semantics = [#tpu.dimension_semantics<parallel>], iteration_bounds = array<i64: 2>, scalar_prefetch = 0 : i64, scratch_operands = 0 : i64, tpu.core_type = #tpu.core_type<tc>, window_params = [{transform_indices = @transform_0, window_bounds = array<i64: 8, 32>}, {pipeline_mode = #tpu.pipeline_mode<synchronous>, transform_indices = @transform_1, window_bounds = array<i64: 1, 32>}, {pipeline_mode = #tpu.pipeline_mode<synchronous>, transform_indices = @transform_2, window_bounds = array<i64: 1, 32>}, {transform_indices = @transform_3, window_bounds = array<i64: 8, 32>}]} {
    %c0 = arith.constant 0 : index
    %c0_0 = arith.constant 0 : index
    %0 = vector.load %arg1[%c0, %c0_0] : memref<8x32xf32, #tpu.memory_space<vmem>>, vector<8x32xf32>
    %cst = arith.constant dense<0.000000e+00> : vector<8xf32>
    %1 = vector.multi_reduction <add>, %0, %cst [1] : vector<8x32xf32> to vector<8xf32>
    %2 = vector.shape_cast %1 : vector<8xf32> to vector<8x1xf32>
    %cst_1 = arith.constant 3.200000e+01 : f32
    %3 = vector.broadcast %cst_1 : f32 to vector<8x1xf32>
    %4 = arith.divf %2, %3 : vector<8x1xf32>
    %5 = vector.broadcast %4 : vector<8x1xf32> to vector<8x32xf32>
    %6 = arith.subf %0, %5 : vector<8x32xf32>
    %7 = arith.mulf %6, %6 : vector<8x32xf32>
    %cst_2 = arith.constant dense<0.000000e+00> : vector<8xf32>
    %8 = vector.multi_reduction <add>, %7, %cst_2 [1] : vector<8x32xf32> to vector<8xf32>
    %9 = vector.shape_cast %8 : vector<8xf32> to vector<8x1xf32>
    %cst_3 = arith.constant 0.0322580636 : f32
    %10 = vector.broadcast %cst_3 : f32 to vector<8x1xf32>
    %11 = arith.mulf %9, %10 : vector<8x1xf32>
    %12 = math.sqrt %11 : vector<8x1xf32>
    %cst_4 = arith.constant 9.99999997E-7 : f32
    %13 = vector.broadcast %cst_4 : f32 to vector<8x1xf32>
    %14 = arith.addf %12, %13 : vector<8x1xf32>
    %cst_5 = arith.constant 1.000000e+00 : f32
    %15 = vector.broadcast %cst_5 : f32 to vector<8x1xf32>
    %16 = arith.divf %15, %14 : vector<8x1xf32>
    %c0_6 = arith.constant 0 : index
    %c0_7 = arith.constant 0 : index
    %17 = vector.load %arg2[%c0_6, %c0_7] : memref<1x32xf32, #tpu.memory_space<vmem>>, vector<1x32xf32>
    %c0_8 = arith.constant 0 : index
    %c0_9 = arith.constant 0 : index
    %18 = vector.load %arg3[%c0_8, %c0_9] : memref<1x32xf32, #tpu.memory_space<vmem>>, vector<1x32xf32>
    %19 = vector.broadcast %16 : vector<8x1xf32> to vector<8x32xf32>
    %20 = arith.mulf %6, %19 : vector<8x32xf32>
    %21 = vector.broadcast %17 : vector<1x32xf32> to vector<8x32xf32>
    %22 = arith.mulf %21, %20 : vector<8x32xf32>
    %23 = vector.broadcast %18 : vector<1x32xf32> to vector<8x32xf32>
    %24 = arith.addf %22, %23 : vector<8x32xf32>
    %c0_10 = arith.constant 0 : index
    %c0_11 = arith.constant 0 : index
    %25 = vector.load %arg4[%c0_10, %c0_11] : memref<8x32xf32, #tpu.memory_space<vmem>>, vector<8x32xf32>
    tpu.vector_store %arg4[%c0_10, %c0_11], %24 {strides = array<i32>} : memref<8x32xf32, #tpu.memory_space<vmem>>, vector<8x32xf32>,
    return
  }
  func.func @transform_0(%arg0: i32) -> (i32, i32) {
    %c0_i32 = arith.constant 0 : i32
    %c0_i32_0 = arith.constant 0 : i32
    return %arg0, %c0_i32 : i32, i32
  }
  func.func @transform_1(%arg0: i32) -> (i32, i32) {
    %c0_i32 = arith.constant 0 : i32
    %c0_i32_0 = arith.constant 0 : i32
    %c0_i32_1 = arith.constant 0 : i32
    return %c0_i32, %c0_i32_0 : i32, i32
  }
  func.func @transform_2(%arg0: i32) -> (i32, i32) {
    %c0_i32 = arith.constant 0 : i32
    %c0_i32_0 = arith.constant 0 : i32
    %c0_i32_1 = arith.constant 0 : i32
    return %c0_i32, %c0_i32_0 : i32, i32
  }
  func.func @transform_3(%arg0: i32) -> (i32, i32) {
    %c0_i32 = arith.constant 0 : i32
    %c0_i32_0 = arith.constant 0 : i32
    return %arg0, %c0_i32 : i32, i32
  }
}

</mosaic_0001>

<bundles_post_ra>
// kernel: tpu_custom_call.1
= control target key start
LH: loop header
LB: loop body
LE: loop exit
PB: predicated region body
PF: predicated region fallthrough
CT: control target
= control target key end

     0   :  { %8 = vsyncpa [#allocation3], 0  ;;  %s645_s0 = inlined_call_operand.hbm [shape: f32[16,32], index: 0, kind: input, shape index: {}]   ;;  %s646_s1 = inlined_call_operand.vmem [shape: f32[1,32], index: 1, kind: input, shape index: {}]   ;;  %s647_s2 = inlined_call_operand.vmem [shape: f32[1,32], index: 2, kind: input, shape index: {}]   ;;  %s648_s3 = inlined_call_operand.hbm [shape: f32[16,32], index: 3, kind: output, shape index: {}]  }
   0x1   :  { %10 = vsyncpa [#allocation3 + $0x1], 0 }
   0x2   :  { %11 = vsyncpa [#allocation4], 0 }
   0x3   :  { %13 = vsyncpa [#allocation4 + $0x1], 0  ;;  %s491_s12 = smov 0   ;;  %s493_s13 = smov 0  }
   0x4   :  { %s495_s14 = smov 0   ;;  %s497_s15 = smov 0  }
   0x5 LB: > { %s512_s16 = sadd.s32 4294967295, %s467_s15   ;;  %s311_s17 = sadd.s32 4294967294, %s467_s15   ;;  %s467_s15 = sphi %s497_s15, %s665_s15   ;;  %s463_s14 = sphi %s495_s14, %s664_s14   ;;  %s459_s13 = sphi %s493_s13, %s663_s13   ;;  %s455_s12 = sphi %s491_s12, %s662_s12  }
   0x6   : > { %s516_s18 = sadd.s32 1, %s467_s15   ;;  %s26_s19 = sadd.s32 1, %s463_s14 }
   0x7   : > { %s23_s20 = ssub.s32 %s467_s15, %s516_s18  ;;  %p33_p0 = scmp.ne.s32.totalorder %s463_s14, %s459_s13 }
   0x8   : > { %p24_p1 = scmp.eq.s32.totalorder %s23_s20, 0  ;;  %p34_p2 = scmp.eq.s32.totalorder %s467_s15, 0 }
   0x9   : > { %p39_p3 = scmp.ne.s32.totalorder %s459_s13, %s455_s12  ;;  %p40_p4 = scmp.eq.s32.totalorder %s512_s16, 0 }
   0xa   : > { %s528_s21 = scalar_select %p24_p1, %s463_s14, %s26_s19  }
   0xb   : > { %p530_p5 = por %p34_p2, %p33_p0  ;;  %p534_p6 = por %p40_p4, %p39_p3 }
   0xc   : > { %p105_p7 = scmp.eq.s32.totalorder %s512_s16, 1  ;;  %p111_p8 = scmp.eq.s32.totalorder %s311_s17, 1 }
   0xd   : > { %s652_s23 = scalar_select %p534_p6, 1, 0 }
   0xe   : > { %p337_p10 = scmp.lt.s32.totalorder %s467_s15, 2  ;;  %p541_p11 = por %p105_p7, %p33_p0 }
   0xf   : > { %p545_p12 = por %p111_p8, %p39_p3  ;;  %s137_s26 = sand.u32 1, %s463_s14  }
  0x10   : > { %s653_s24 = scalar_select %p541_p11, 1, 0 }
  0x11   : > { %s654_s25 = scalar_select %p545_p12, 1, 0 }
  0x12   : > { %s315_s27 = sshll.u32 %s467_s15, 7  ;;  %s314_s28 = sshll.u32 %s137_s26, 3 }
  0x13   : > { %s554_s4 = scalar_lea.hbm %s645_s0, %s315_s27  ;;  %s141_s5 = scalar_lea.vmem [#allocation2], %s314_s28 }
  0x14   : > { %s148_s6 = sshll.u32 %s141_s5, 4  ;;  %p558_p13 = pnand %p337_p10, %p530_p5  ;;  %s562_s6 = int_to_ptr.vmem [resolvable:$true] %s148_s6 }
  0x15   : > { %s138_s8 = scalar_lea.sflag [#allocation3], %s137_s26  ;;  %s375_s9 = scalar_lea.hbm %s554_s4, 128 }
  0x16   : > { %p376_p2 = scmp.ne.s32.totalorder %s554_s4, %s375_s9  ;;  %p377_p3 = pneg %p558_p13 }
  0x17   : > { %s380_s17 = scalar_lea.hbm %s645_s0, 256  ;;  %p381_p5 = scmp.lt.s32.totalorder %s554_s4, %s645_s0 }
  0x18   : > { %p378_p4 = pnand %p377_p3, %p376_p2  ;;  %p382_p8 = scmp.lt.s32.totalorder %s380_s17, %s375_s9 }
  0x1a   : > { %p379_p7 = pneg %p378_p4  ;;  %p383_p10 = por %p382_p8, %p381_p5 }
  0x1c   : > { %p384_p9 = pnand %p383_p10, %p379_p7 }
  0x1e   : > { %387 = shalt.err (!%p384_p9)
}
  0x1f   : > { %s388_s22 = scalar_lea.vmem %s562_s6, 128  ;;  %s469_s26 = smov [#allocation2]  }
  0x20   : > { %p389_p0 = scmp.ne.s32.totalorder %s562_s6, %s388_s22  ;;  %s393_s27 = sshll.u32 %s469_s26, 4  ;;  %s394_s27 = int_to_ptr.vmem [resolvable:$false] %s393_s27 }
  0x21   : > { %s395_s28 = scalar_lea.vmem %s394_s27, 256  ;;  %p396_p4 = scmp.lt.s32.totalorder %s562_s6, %s394_s27 }
  0x22   : > { %p391_p1 = pnand %p389_p0, %p377_p3  ;;  %p397_p12 = scmp.lt.s32.totalorder %s395_s28, %s388_s22 }
  0x24   : > { %p392_p2 = pneg %p391_p1  ;;  %p398_p11 = por %p397_p12, %p396_p4 }
  0x26   : > { %p399_p6 = pnand %p398_p11, %p392_p2 }
  0x28   : > { %402 = shalt.err (!%p399_p6)
}
  0x29   : > { %332 = dma.hbm_to_vmem [thread:$0]  (!%p558_p13), %s554_s4, 128, %s562_s6, %s138_s8  }
  0x2a   : > { %p656_p9 = scmp.lt.s32.totalorder %s467_s15, 3  ;;  %p657_p7 = scmp.ge.s32.totalorder %s467_s15, 1 }
  0x2c   : > { %p154_p0 = pnand %p657_p7, %p656_p9 }
  0x2d   : > { %s589_s29 = sand.u32 (!%p154_p0), 1, %s459_s13   ;;  %p658_p6 = scmp.ne.s32.totalorder (!%p154_p0), %s652_s23, 0 }
  0x2e   : > { %157 = sbr.rel (%p154_p0) target bundleno = 392 (0x188), region = 32  ;;  %s317_s30 = sshll.u32 (!%p154_p0), %s589_s29, 3 }
  0x2f   : > { %s160_s5 = scalar_lea.sflag (!%p154_p0), [#allocation3], %s589_s29  ;;  %s163_s7 = scalar_lea.vmem (!%p154_p0), [#allocation2], %s317_s30 }
  0x33   : > { %446 = dma.done.wait (%p658_p6), %s160_s5, 128  }
  0x34   : > { %448 = vsyncadd (%p658_p6), %s160_s5, 4294967168  ;;  %vm187_vm0 = vcmask 261120   ;;  %v186_v0 = vld [vmem:[%s163_s7] sm:$0xff]  ;;  %s322_s9 = sshll.u32 %s512_s16, 7  ;;  %s185_s10 = scalar_lea.vmem [#allocation5], %s317_s30 }
  0x35   : > { %v188_v1 = vsel %vm187_vm0, %v186_v0, 0.0  ;;  %v319_v16 = vld [vmem:[%s646_s1] ss:$0 sm:$0xff]  ;;  %s241_s11 = sshll.u32 %s185_s10, 4  ;;  %s239_s20 = scalar_lea.hbm %s648_s3, %s322_s9  ;;  %s242_s11 = int_to_ptr.vmem [resolvable:$true] %s241_s11 }
  0x36   : > { %189 = vadd.xlane.f32.xlu0 %v188_v1  ;;  %v320_v18 = vld [vmem:[%s647_s2] ss:$0 sm:$0xff]  ;;  %s228_s22 = scalar_lea.sflag [#allocation4], %s589_s29  ;;  %s403_s26 = scalar_lea.vmem %s242_s11, 128 }
  0x37   : > { %p404_p11 = scmp.ne.s32.totalorder %s242_s11, %s403_s26  ;;  %p659_p12 = scmp.ne.s32.totalorder %s653_s24, 0 }
  0x38   : > { %s470_s27 = smov [#allocation5]  }
  0x39   : > { %p405_p13 = pnand %p404_p11, %p659_p12  ;;  %s407_s16 = sshll.u32 %s470_s27, 4  ;;  %s408_s16 = int_to_ptr.vmem [resolvable:$false] %s407_s16 }
  0x3a   : > { %s409_s28 = scalar_lea.vmem %s408_s16, 256  ;;  %p410_p3 = scmp.lt.s32.totalorder %s242_s11, %s408_s16 }
  0x3b   : > { %p406_p1 = pneg %p405_p13  ;;  %p411_p5 = scmp.lt.s32.totalorder %s409_s28, %s403_s26 }
  0x3d   : > { %p412_p8 = por %p411_p5, %p410_p3 }
  0x3f   : > { %p413_p10 = pnand %p412_p8, %p406_p1 }
  0xbf   : > { %v190_v2 = vpop.xlane.xlu0 %189 }
  0xc0   : > { %v192_v3 = vmul.f32 0.03125, %v190_v2 }
  0xc2   : > { %v193_v4 = vsub.f32 %v186_v0, %v192_v3 }
  0xc4   : > { %v194_v5 = vmul.f32 %v193_v4, %v193_v4 }
  0xc6   : > { %v195_v6 = vsel %vm187_vm0, %v194_v5, 0.0 }
  0xc7   : > { %196 = vadd.xlane.f32.xlu0 %v195_v6 }
 0x150   : > { %v197_v7 = vpop.xlane.xlu0 %196 }
 0x151   : > { %v198_v8 = vmul.f32 0.032258064, %v197_v7 }
 0x153   : > { %371 = vrsqrt.f32 %v198_v8  ;;  %vm201_vm1 = vcmp.eq.f32.partialorder %v198_v8, inf  ;;  %v204_v11 = vand.u32 2147483648, %v198_v8  ;;  %vm203_vm2 = vcmp.eq.f32.partialorder %v198_v8, 0.0 }
 0x160   : > { %v372_v9 = vpop.eup %371 }
 0x161   : > { %v200_v10 = vmul.f32 %v372_v9, %v198_v8 }
 0x163   : > { %v202_v12 = vsel %vm201_vm1, %v198_v8, %v200_v10 }
 0x164   : > { %v205_v13 = vsel %vm203_vm2, %v204_v11, %v202_v12 }
 0x165   : > { %v206_v14 = vadd.f32 1e-06, %v205_v13 }
 0x167   : > { %373 = vrcp.f32 %v206_v14 }
 0x174   : > { %v374_v15 = vpop.eup %373 }
 0x175   : > { %v211_v17 = vmul.f32 %v374_v15, %v193_v4 }
 0x177   : > { %v218_v19 = vmul.f32 %v319_v16, %v211_v17 }
 0x179   : > { %v225_v20 = vadd.f32 %v320_v18, %v218_v19 }
 0x17b   : > { %226 = vst.msk [vmem:[%s185_s10] sm:$0xff] %vm187_vm0, %v225_v20 }
 0x17c   : > { %416 = shalt.err (!%p413_p10)
}
 0x17d   : > { %s417_s30 = scalar_lea.hbm %s239_s20, 128  ;;  %s421_s7 = scalar_lea.hbm %s648_s3, 256 }
 0x17e   : > { %p418_p2 = scmp.ne.s32.totalorder %s239_s20, %s417_s30  ;;  %p422_p7 = scmp.lt.s32.totalorder %s239_s20, %s648_s3 }
 0x17f   : > { %p423_p0 = scmp.lt.s32.totalorder %s421_s7, %s417_s30 }
 0x180   : > { %p419_p4 = pnand %p418_p2, %p659_p12 }
 0x181   : > { %p424_p6 = por %p423_p0, %p422_p7 }
 0x182   : > { %p420_p9 = pneg %p419_p4 }
 0x184   : > { %p425_p11 = pnand %p424_p6, %p420_p9 }
 0x186   : > { %428 = shalt.err (!%p425_p11)
}
 0x187   : > { %327 = dma.vmem_to_hbm [thread:$0]  (%p659_p12), %s242_s11, 128, %s239_s20, %s228_s22  }
 0x188 PF: > { %s253_s6 = sand.u32 1, %s455_s12   ;;  %p660_p13 = scmp.ne.s32.totalorder %s654_s25, 0 }
 0x189   : > { %p661_p1 = scmp.ge.s32.totalorder %s467_s15, 2  ;;  %s254_s8 = scalar_lea.sflag [#allocation4], %s253_s6 }
 0x18b   : > { %p334_p3 = pnand %p661_p1, %p660_p13 }
 0x18d   : > { %p335_p5 = pneg %p334_p3 }
 0x18f   : > { %450 = dma.done.wait (%p335_p5), %s254_s8, 128  }
 0x190   : > { %452 = vsyncadd (%p335_p5), %s254_s8, 4294967168  ;;  %p16_p8 = scmp.ge.s32.totalorder %s516_s18, 4   ;;  %s662_s12 = smov %s459_s13 }
 0x191   : > { %s663_s13 = smov %s463_s14  ;;  %s664_s14 = smov %s528_s21 }
 0x192   : > { %s665_s15 = smov %s516_s18  ;;  %18 = sbr.rel (!%p16_p8) target bundleno = 5 (0x5), region = 77 }
 0x197   :  { %259 = vsyncpa [#allocation3], 1 }
 0x198   :  { %261 = vsyncpa [#allocation3 + $0x1], 1 }
 0x199   :  { %262 = vsyncpa [#allocation4], 1 }
 0x19a   :  { %264 = vsyncpa [#allocation4 + $0x1], 1 }

</bundles_post_ra>
